<compile_context>
chip_gen: v5e
topology: v5e:2x2
jax: 0.10.0
libtpu: 0.0.40
codegen_flags: <defaults>
</compile_context>

<pallas_src>
import functools

import jax
import jax.numpy as jnp
from jax.experimental import pallas as pl
from jax.experimental.pallas import tpu as pltpu


def _sbb_kernel(x_ref, col_ref, w1_ref, b1_ref, w2_ref, b2_ref,
                w3_ref, b3_ref, w4_ref, b4_ref, out_ref, *, H, W):
    """Fused small_basic_block for one batch element.

    x_ref  : (1, Cin, HW)   bf16   input image, spatial flattened on lanes
    col_ref: (1, HW)        int32  w-coordinate of each flattened position
    w1_ref : (C4, Cin)      bf16   1x1 conv
    w2_ref : (C4, 3*C4)     bf16   (3,1) conv, 3 taps stacked on contraction
    w3_ref : (C4, 3*C4)     bf16   (1,3) conv, 3 taps stacked on contraction
    w4_ref : (Cout, C4)     bf16   1x1 conv
    b*_ref : (C, 1)         f32    biases (broadcast along lanes)
    out_ref: (1, Cout, HW)  f32
    """
    HW = H * W
    x = x_ref[0]                          # (Cin, HW) bf16
    cdt = x.dtype                         # MXU operand dtype (bf16)

    # ---- stage 1: 1x1 conv + ReLU  -> (C4, HW) f32 -----------------------
    y1 = jnp.dot(w1_ref[...], x, preferred_element_type=jnp.float32)
    y1 = jnp.maximum(y1 + b1_ref[...], 0.0)

    # flattened-position iota (for the H-direction boundary masks)
    pos = jax.lax.broadcasted_iota(jnp.int32, (1, HW), 1)
    col = col_ref[...]                    # w-coordinate of every position

    # ---- stage 2: (3,1) conv along H, pad (1,0), + ReLU ------------------
    # Neighbouring rows are +/- W lanes away in the flattened layout.
    # roll + mask replaces zero-pad/concat/slice; taps fused into one K=3*C4 dot.
    up = jnp.where(pos < W, 0.0, pltpu.roll(y1, W, axis=1))           # y1[h-1]
    down = jnp.where(pos >= HW - W, 0.0, pltpu.roll(y1, HW - W, axis=1))  # y1[h+1]
    x2 = jnp.concatenate([up, y1, down], axis=0).astype(cdt)          # (3*C4, HW)
    y2 = jnp.dot(w2_ref[...], x2, preferred_element_type=jnp.float32)
    y2 = jnp.maximum(y2 + b2_ref[...], 0.0)

    # ---- stage 3: (1,3) conv along W, pad (0,1), + ReLU ------------------
    # Neighbouring columns are +/- 1 lane away; mask the row edges.
    left = jnp.where(col == 0, 0.0, pltpu.roll(y2, 1, axis=1))        # y2[w-1]
    right = jnp.where(col == W - 1, 0.0, pltpu.roll(y2, HW - 1, axis=1))  # y2[w+1]
    x3 = jnp.concatenate([left, y2, right], axis=0).astype(cdt)       # (3*C4, HW)
    y3 = jnp.dot(w3_ref[...], x3, preferred_element_type=jnp.float32)
    y3 = jnp.maximum(y3 + b3_ref[...], 0.0)

    # ---- stage 4: 1x1 conv (no activation) -> lane-dense store -----------
    out = jnp.dot(w4_ref[...], y3.astype(cdt),
                  preferred_element_type=jnp.float32)
    out_ref[0] = (out + b4_ref[...]).astype(out_ref.dtype)


def small_basic_block_pallas(x_nchw, params, *, compute_dtype=jnp.bfloat16):
    """x_nchw: (N, Cin, H, W) float32. Returns (N, Cout, H, W) float32."""
    w1, b1, w2, b2, w3, b3, w4, b4 = params    # kernel-layout f32 params
    N, Cin, H, W = x_nchw.shape
    C4 = w1.shape[0]
    Cout = w4.shape[0]
    HW = H * W

    # NCHW kept; flattening (H, W) -> HW is a free contiguous reshape.
    x = x_nchw.reshape(N, Cin, HW).astype(compute_dtype)

    w1c = w1.astype(compute_dtype)
    w2c = w2.astype(compute_dtype)
    w3c = w3.astype(compute_dtype)
    w4c = w4.astype(compute_dtype)
    b1c = b1.reshape(C4, 1).astype(jnp.float32)
    b2c = b2.reshape(C4, 1).astype(jnp.float32)
    b3c = b3.reshape(C4, 1).astype(jnp.float32)
    b4c = b4.reshape(Cout, 1).astype(jnp.float32)

    # w-coordinate of every flattened spatial position (used in-kernel to zero
    # the wrapped lanes of the width-direction rolls).
    col_ids = (jnp.arange(HW, dtype=jnp.int32) % W).reshape(1, HW)

    kernel = functools.partial(_sbb_kernel, H=H, W=W)

    out = pl.pallas_call(
        kernel,
        out_shape=jax.ShapeDtypeStruct((N, Cout, HW), jnp.float32),
        grid_spec=pltpu.PrefetchScalarGridSpec(
            num_scalar_prefetch=0,
            grid=(N,),
            in_specs=[
                pl.BlockSpec((1, Cin, HW), lambda n: (n, 0, 0)),
                pl.BlockSpec((1, HW), lambda n: (0, 0)),
                pl.BlockSpec((C4, Cin), lambda n: (0, 0)),
                pl.BlockSpec((C4, 1), lambda n: (0, 0)),
                pl.BlockSpec((C4, 3 * C4), lambda n: (0, 0)),
                pl.BlockSpec((C4, 1), lambda n: (0, 0)),
                pl.BlockSpec((C4, 3 * C4), lambda n: (0, 0)),
                pl.BlockSpec((C4, 1), lambda n: (0, 0)),
                pl.BlockSpec((Cout, C4), lambda n: (0, 0)),
                pl.BlockSpec((Cout, 1), lambda n: (0, 0)),
            ],
            out_specs=pl.BlockSpec((1, Cout, HW), lambda n: (n, 0, 0)),
        ),
        compiler_params=pltpu.CompilerParams(
            dimension_semantics=("parallel",),
            vmem_limit_bytes=32 * 1024 * 1024,
        ),
    )(x, col_ids, w1c, b1c, w2c, b2c, w3c, b3c, w4c, b4c)

    return out.reshape(N, Cout, H, W)


def make_params(key, ch_in, ch_out):
    """Deterministic params in PyTorch Conv2d layout + kernel (matmul) layout."""
    c4 = ch_out // 4
    ks = jax.random.split(key, 8)
    # PyTorch layout: (out_ch, in_ch, kH, kW)
    w1_t = jax.random.normal(ks[0], (c4, ch_in, 1, 1), jnp.float32) * 0.1
    b1_t = jax.random.normal(ks[1], (c4,), jnp.float32) * 0.1
    w2_t = jax.random.normal(ks[2], (c4, c4, 3, 1), jnp.float32) * 0.1
    b2_t = jax.random.normal(ks[3], (c4,), jnp.float32) * 0.1
    w3_t = jax.random.normal(ks[4], (c4, c4, 1, 3), jnp.float32) * 0.1
    b3_t = jax.random.normal(ks[5], (c4,), jnp.float32) * 0.1
    w4_t = jax.random.normal(ks[6], (ch_out, c4, 1, 1), jnp.float32) * 0.1
    b4_t = jax.random.normal(ks[7], (ch_out,), jnp.float32) * 0.1

    # Kernel layout: (C_out, K) matrices; the 3 taps of each separable conv
    # are stacked along the contraction axis (tap order kh/kw = 0, 1, 2,
    # matching the [shift -1, 0, +1] stacking inside the kernel).
    w1k = w1_t[:, :, 0, 0]                                               # (C4, Cin)
    w2k = jnp.concatenate([w2_t[:, :, kh, 0] for kh in range(3)], axis=1)  # (C4, 3*C4)
    w3k = jnp.concatenate([w3_t[:, :, 0, kw] for kw in range(3)], axis=1)  # (C4, 3*C4)
    w4k = w4_t[:, :, 0, 0]                                               # (Cout, C4)

    kparams = (w1k, b1_t, w2k, b2_t, w3k, b3_t, w4k, b4_t)
    torch_params = (w1_t, b1_t, w2_t, b2_t, w3_t, b3_t, w4_t, b4_t)
    return kparams, torch_params


def reference_forward(x_nchw, torch_params, compute_dtype=jnp.bfloat16):
    """Plain-JAX reference mirroring PyTorch Conv2d (NCHW, OIHW weights).

    Operands are cast to the same compute dtype the kernel feeds the MXU
    (bf16) with f32 accumulation, so the comparison is apples-to-apples.
    """
    w1, b1, w2, b2, w3, b3, w4, b4 = torch_params

    def conv(x, w, b, pad):
        y = jax.lax.conv_general_dilated(
            x.astype(compute_dtype), w.astype(compute_dtype),
            window_strides=(1, 1), padding=pad,
            dimension_numbers=("NCHW", "OIHW", "NCHW"),
            preferred_element_type=jnp.float32)
        return y + b.reshape(1, -1, 1, 1)

    y = jax.nn.relu(conv(x_nchw, w1, b1, [(0, 0), (0, 0)]))
    y = jax.nn.relu(conv(y, w2, b2, [(1, 1), (0, 0)]))
    y = jax.nn.relu(conv(y, w3, b3, [(0, 0), (1, 1)]))
    return conv(y, w4, b4, [(0, 0), (0, 0)])


if __name__ == "__main__":
    key = jax.random.PRNGKey(0)
    k_x, k_p = jax.random.split(key)

    N, CH_IN, CH_OUT, H, W = 2, 4, 32, 16, 16
    x = jax.random.normal(k_x, (N, CH_IN, H, W), jnp.float32)

    kparams, torch_params = make_params(k_p, CH_IN, CH_OUT)

    out = small_basic_block_pallas(x, kparams)
    out = jax.block_until_ready(out)

    ref = reference_forward(x, torch_params)
    assert out.shape == (N, CH_OUT, H, W)
    max_err = float(jnp.max(jnp.abs(out - ref)))
    assert max_err < 2e-3, f"mismatch vs reference: max|diff|={max_err}"

    print("KERNEL_OK")
</pallas_src>

<mosaic_0001>
module attributes {stable_mosaic.version = 11 : i64} {
  func.func @_sbb_kernel(%arg0: i32, %arg1: memref<1x4x256xbf16, #tpu.memory_space<vmem>>, %arg2: memref<1x256xi32, #tpu.memory_space<vmem>>, %arg3: memref<8x4xbf16, #tpu.memory_space<vmem>>, %arg4: memref<8x1xf32, #tpu.memory_space<vmem>>, %arg5: memref<8x24xbf16, #tpu.memory_space<vmem>>, %arg6: memref<8x1xf32, #tpu.memory_space<vmem>>, %arg7: memref<8x24xbf16, #tpu.memory_space<vmem>>, %arg8: memref<8x1xf32, #tpu.memory_space<vmem>>, %arg9: memref<32x8xbf16, #tpu.memory_space<vmem>>, %arg10: memref<32x1xf32, #tpu.memory_space<vmem>>, %arg11: memref<1x32x256xf32, #tpu.memory_space<vmem>>) attributes {dimension_semantics = [#tpu.dimension_semantics<parallel>], iteration_bounds = array<i64: 2>, scalar_prefetch = 0 : i64, scratch_operands = 0 : i64, tpu.core_type = #tpu.core_type<tc>, window_params = [{transform_indices = @transform_0, window_bounds = array<i64: 1, 4, 256>}, {pipeline_mode = #tpu.pipeline_mode<synchronous>, transform_indices = @transform_1, window_bounds = array<i64: 1, 256>}, {pipeline_mode = #tpu.pipeline_mode<synchronous>, transform_indices = @transform_2, window_bounds = array<i64: 8, 4>}, {pipeline_mode = #tpu.pipeline_mode<synchronous>, transform_indices = @transform_3, window_bounds = array<i64: 8, 1>}, {pipeline_mode = #tpu.pipeline_mode<synchronous>, transform_indices = @transform_4, window_bounds = array<i64: 8, 24>}, {pipeline_mode = #tpu.pipeline_mode<synchronous>, transform_indices = @transform_5, window_bounds = array<i64: 8, 1>}, {pipeline_mode = #tpu.pipeline_mode<synchronous>, transform_indices = @transform_6, window_bounds = array<i64: 8, 24>}, {pipeline_mode = #tpu.pipeline_mode<synchronous>, transform_indices = @transform_7, window_bounds = array<i64: 8, 1>}, {pipeline_mode = #tpu.pipeline_mode<synchronous>, transform_indices = @transform_8, window_bounds = array<i64: 32, 8>}, {pipeline_mode = #tpu.pipeline_mode<synchronous>, transform_indices = @transform_9, window_bounds = array<i64: 32, 1>}, {transform_indices = @transform_10, window_bounds = array<i64: 1, 32, 256>}]} {
    %c0 = arith.constant 0 : index
    %c0_0 = arith.constant 0 : index
    %c0_1 = arith.constant 0 : index
    %0 = vector.load %arg1[%c0, %c0_0, %c0_1] : memref<1x4x256xbf16, #tpu.memory_space<vmem>>, vector<1x4x256xbf16>
    %1 = vector.shape_cast %0 : vector<1x4x256xbf16> to vector<4x256xbf16>
    %c0_2 = arith.constant 0 : index
    %c0_3 = arith.constant 0 : index
    %2 = vector.load %arg3[%c0_2, %c0_3] : memref<8x4xbf16, #tpu.memory_space<vmem>>, vector<8x4xbf16>
    %cst = arith.constant dense<0.000000e+00> : vector<8x256xf32>
    %3 = tpu.matmul %2, %1, %cst {dimension_numbers = #tpu.dot_dimension_numbers<[1], [0], [0], [1], [0, 0, 1, 1], [], []>} : vector<8x4xbf16>, vector<4x256xbf16>, vector<8x256xf32> -> vector<8x256xf32>
    %c0_4 = arith.constant 0 : index
    %c0_5 = arith.constant 0 : index
    %4 = vector.load %arg4[%c0_4, %c0_5] : memref<8x1xf32, #tpu.memory_space<vmem>>, vector<8x1xf32>
    %5 = vector.broadcast %4 : vector<8x1xf32> to vector<8x256xf32>
    %6 = arith.addf %3, %5 : vector<8x256xf32>
    %cst_6 = arith.constant 0.000000e+00 : f32
    %7 = vector.broadcast %cst_6 : f32 to vector<8x256xf32>
    %8 = arith.maximumf %6, %7 : vector<8x256xf32>
    %9 = tpu.iota {dimensions = array<i32: 1>} : vector<1x256xi32>
    %c0_7 = arith.constant 0 : index
    %c0_8 = arith.constant 0 : index
    %10 = vector.load %arg2[%c0_7, %c0_8] : memref<1x256xi32, #tpu.memory_space<vmem>>, vector<1x256xi32>
    %c16_i32 = arith.constant 16 : i32
    %11 = vector.broadcast %c16_i32 : i32 to vector<1x256xi32>
    %12 = arith.cmpi slt, %9, %11 : vector<1x256xi32>
    %c16_i32_9 = arith.constant 16 : i32
    %13 = tpu.dynamic_rotate %8 by %c16_i32_9 dim 1 : vector<8x256xf32>, i32 -> vector<8x256xf32>
    %cst_10 = arith.constant 0.000000e+00 : f32
    %14 = vector.shape_cast %12 : vector<1x256xi1> to vector<1x256xi1>
    %15 = vector.broadcast %14 : vector<1x256xi1> to vector<8x256xi1>
    %16 = vector.broadcast %cst_10 : f32 to vector<8x256xf32>
    %17 = arith.select %15, %16, %13 : vector<8x256xi1>, vector<8x256xf32>
    %c240_i32 = arith.constant 240 : i32
    %18 = vector.broadcast %c240_i32 : i32 to vector<1x256xi32>
    %19 = arith.cmpi sge, %9, %18 : vector<1x256xi32>
    %c240_i32_11 = arith.constant 240 : i32
    %20 = tpu.dynamic_rotate %8 by %c240_i32_11 dim 1 : vector<8x256xf32>, i32 -> vector<8x256xf32>
    %cst_12 = arith.constant 0.000000e+00 : f32
    %21 = vector.shape_cast %19 : vector<1x256xi1> to vector<1x256xi1>
    %22 = vector.broadcast %21 : vector<1x256xi1> to vector<8x256xi1>
    %23 = vector.broadcast %cst_12 : f32 to vector<8x256xf32>
    %24 = arith.select %22, %23, %20 : vector<8x256xi1>, vector<8x256xf32>
    %25 = tpu.concatenate %17, %8, %24 in 0 : vector<8x256xf32>, vector<8x256xf32>, vector<8x256xf32> -> vector<24x256xf32>
    %26 = arith.truncf %25 : vector<24x256xf32> to vector<24x256xbf16>
    %c0_13 = arith.constant 0 : index
    %c0_14 = arith.constant 0 : index
    %27 = vector.load %arg5[%c0_13, %c0_14] : memref<8x24xbf16, #tpu.memory_space<vmem>>, vector<8x24xbf16>
    %cst_15 = arith.constant dense<0.000000e+00> : vector<8x256xf32>
    %28 = tpu.matmul %27, %26, %cst_15 {dimension_numbers = #tpu.dot_dimension_numbers<[1], [0], [0], [1], [0, 0, 1, 1], [], []>} : vector<8x24xbf16>, vector<24x256xbf16>, vector<8x256xf32> -> vector<8x256xf32>
    %c0_16 = arith.constant 0 : index
    %c0_17 = arith.constant 0 : index
    %29 = vector.load %arg6[%c0_16, %c0_17] : memref<8x1xf32, #tpu.memory_space<vmem>>, vector<8x1xf32>
    %30 = vector.broadcast %29 : vector<8x1xf32> to vector<8x256xf32>
    %31 = arith.addf %28, %30 : vector<8x256xf32>
    %cst_18 = arith.constant 0.000000e+00 : f32
    %32 = vector.broadcast %cst_18 : f32 to vector<8x256xf32>
    %33 = arith.maximumf %31, %32 : vector<8x256xf32>
    %c0_i32 = arith.constant 0 : i32
    %34 = vector.broadcast %c0_i32 : i32 to vector<1x256xi32>
    %35 = arith.cmpi eq, %10, %34 : vector<1x256xi32>
    %c1_i32 = arith.constant 1 : i32
    %36 = tpu.dynamic_rotate %33 by %c1_i32 dim 1 : vector<8x256xf32>, i32 -> vector<8x256xf32>
    %cst_19 = arith.constant 0.000000e+00 : f32
    %37 = vector.shape_cast %35 : vector<1x256xi1> to vector<1x256xi1>
    %38 = vector.broadcast %37 : vector<1x256xi1> to vector<8x256xi1>
    %39 = vector.broadcast %cst_19 : f32 to vector<8x256xf32>
    %40 = arith.select %38, %39, %36 : vector<8x256xi1>, vector<8x256xf32>
    %c15_i32 = arith.constant 15 : i32
    %41 = vector.broadcast %c15_i32 : i32 to vector<1x256xi32>
    %42 = arith.cmpi eq, %10, %41 : vector<1x256xi32>
    %c255_i32 = arith.constant 255 : i32
    %43 = tpu.dynamic_rotate %33 by %c255_i32 dim 1 : vector<8x256xf32>, i32 -> vector<8x256xf32>
    %cst_20 = arith.constant 0.000000e+00 : f32
    %44 = vector.shape_cast %42 : vector<1x256xi1> to vector<1x256xi1>
    %45 = vector.broadcast %44 : vector<1x256xi1> to vector<8x256xi1>
    %46 = vector.broadcast %cst_20 : f32 to vector<8x256xf32>
    %47 = arith.select %45, %46, %43 : vector<8x256xi1>, vector<8x256xf32>
    %48 = tpu.concatenate %40, %33, %47 in 0 : vector<8x256xf32>, vector<8x256xf32>, vector<8x256xf32> -> vector<24x256xf32>
    %49 = arith.truncf %48 : vector<24x256xf32> to vector<24x256xbf16>
    %c0_21 = arith.constant 0 : index
    %c0_22 = arith.constant 0 : index
    %50 = vector.load %arg7[%c0_21, %c0_22] : memref<8x24xbf16, #tpu.memory_space<vmem>>, vector<8x24xbf16>
    %cst_23 = arith.constant dense<0.000000e+00> : vector<8x256xf32>
    %51 = tpu.matmul %50, %49, %cst_23 {dimension_numbers = #tpu.dot_dimension_numbers<[1], [0], [0], [1], [0, 0, 1, 1], [], []>} : vector<8x24xbf16>, vector<24x256xbf16>, vector<8x256xf32> -> vector<8x256xf32>
    %c0_24 = arith.constant 0 : index
    %c0_25 = arith.constant 0 : index
    %52 = vector.load %arg8[%c0_24, %c0_25] : memref<8x1xf32, #tpu.memory_space<vmem>>, vector<8x1xf32>
    %53 = vector.broadcast %52 : vector<8x1xf32> to vector<8x256xf32>
    %54 = arith.addf %51, %53 : vector<8x256xf32>
    %cst_26 = arith.constant 0.000000e+00 : f32
    %55 = vector.broadcast %cst_26 : f32 to vector<8x256xf32>
    %56 = arith.maximumf %54, %55 : vector<8x256xf32>
    %c0_27 = arith.constant 0 : index
    %c0_28 = arith.constant 0 : index
    %57 = vector.load %arg9[%c0_27, %c0_28] : memref<32x8xbf16, #tpu.memory_space<vmem>>, vector<32x8xbf16>
    %58 = arith.truncf %56 : vector<8x256xf32> to vector<8x256xbf16>
    %cst_29 = arith.constant dense<0.000000e+00> : vector<32x256xf32>
    %59 = tpu.matmul %57, %58, %cst_29 {dimension_numbers = #tpu.dot_dimension_numbers<[1], [0], [0], [1], [0, 0, 1, 1], [], []>} : vector<32x8xbf16>, vector<8x256xbf16>, vector<32x256xf32> -> vector<32x256xf32>
    %c0_30 = arith.constant 0 : index
    %c0_31 = arith.constant 0 : index
    %60 = vector.load %arg10[%c0_30, %c0_31] : memref<32x1xf32, #tpu.memory_space<vmem>>, vector<32x1xf32>
    %61 = vector.broadcast %60 : vector<32x1xf32> to vector<32x256xf32>
    %62 = arith.addf %59, %61 : vector<32x256xf32>
    %c0_32 = arith.constant 0 : index
    %c0_33 = arith.constant 0 : index
    %c0_34 = arith.constant 0 : index
    %63 = vector.load %arg11[%c0_32, %c0_33, %c0_34] : memref<1x32x256xf32, #tpu.memory_space<vmem>>, vector<1x32x256xf32>
    %64 = vector.shape_cast %63 : vector<1x32x256xf32> to vector<32x256xf32>
    %65 = vector.shape_cast %62 : vector<32x256xf32> to vector<1x32x256xf32>
    tpu.vector_store %arg11[%c0_32, %c0_33, %c0_34], %65 {strides = array<i32>} : memref<1x32x256xf32, #tpu.memory_space<vmem>>, vector<1x32x256xf32>,
    return
  }
  func.func @transform_0(%arg0: i32) -> (i32, i32, i32) {
    %c0_i32 = arith.constant 0 : i32
    %c0_i32_0 = arith.constant 0 : i32
    %c0_i32_1 = arith.constant 0 : i32
    return %arg0, %c0_i32, %c0_i32_0 : i32, i32, i32
  }
  func.func @transform_1(%arg0: i32) -> (i32, i32) {
    %c0_i32 = arith.constant 0 : i32
    %c0_i32_0 = arith.constant 0 : i32
    %c0_i32_1 = arith.constant 0 : i32
    return %c0_i32, %c0_i32_0 : i32, i32
  }
  func.func @transform_2(%arg0: i32) -> (i32, i32) {
    %c0_i32 = arith.constant 0 : i32
    %c0_i32_0 = arith.constant 0 : i32
    %c0_i32_1 = arith.constant 0 : i32
    return %c0_i32, %c0_i32_0 : i32, i32
  }
  func.func @transform_3(%arg0: i32) -> (i32, i32) {
    %c0_i32 = arith.constant 0 : i32
    %c0_i32_0 = arith.constant 0 : i32
    %c0_i32_1 = arith.constant 0 : i32
    return %c0_i32, %c0_i32_0 : i32, i32
  }
  func.func @transform_4(%arg0: i32) -> (i32, i32) {
    %c0_i32 = arith.constant 0 : i32
    %c0_i32_0 = arith.constant 0 : i32
    %c0_i32_1 = arith.constant 0 : i32
    return %c0_i32, %c0_i32_0 : i32, i32
  }
  func.func @transform_5(%arg0: i32) -> (i32, i32) {
    %c0_i32 = arith.constant 0 : i32
    %c0_i32_0 = arith.constant 0 : i32
    %c0_i32_1 = arith.constant 0 : i32
    return %c0_i32, %c0_i32_0 : i32, i32
  }
  func.func @transform_6(%arg0: i32) -> (i32, i32) {
    %c0_i32 = arith.constant 0 : i32
    %c0_i32_0 = arith.constant 0 : i32
    %c0_i32_1 = arith.constant 0 : i32
    return %c0_i32, %c0_i32_0 : i32, i32
  }
  func.func @transform_7(%arg0: i32) -> (i32, i32) {
    %c0_i32 = arith.constant 0 : i32
    %c0_i32_0 = arith.constant 0 : i32
    %c0_i32_1 = arith.constant 0 : i32
    return %c0_i32, %c0_i32_0 : i32, i32
  }
  func.func @transform_8(%arg0: i32) -> (i32, i32) {
    %c0_i32 = arith.constant 0 : i32
    %c0_i32_0 = arith.constant 0 : i32
    %c0_i32_1 = arith.constant 0 : i32
    return %c0_i32, %c0_i32_0 : i32, i32
  }
  func.func @transform_9(%arg0: i32) -> (i32, i32) {
    %c0_i32 = arith.constant 0 : i32
    %c0_i32_0 = arith.constant 0 : i32
    %c0_i32_1 = arith.constant 0 : i32
    return %c0_i32, %c0_i32_0 : i32, i32
  }
  func.func @transform_10(%arg0: i32) -> (i32, i32, i32) {
    %c0_i32 = arith.constant 0 : i32
    %c0_i32_0 = arith.constant 0 : i32
    %c0_i32_1 = arith.constant 0 : i32
    return %arg0, %c0_i32, %c0_i32_0 : i32, i32, i32
  }
}

</mosaic_0001>

<bundles_post_ra>
// kernel: tpu_custom_call.1
= control target key start
LH: loop header
LB: loop body
LE: loop exit
PB: predicated region body
PF: predicated region fallthrough
CT: control target
= control target key end

     0   :  { %15 = vsyncpa [#allocation3], 0  ;;  %s1144_s0 = inlined_call_operand.vmem [shape: bf16[2,4,256], index: 0, kind: input, shape index: {}]   ;;  %s1145_s1 = inlined_call_operand.vmem [shape: s32[1,256], index: 1, kind: input, shape index: {}]   ;;  %s1146_s2 = inlined_call_operand.vmem [shape: bf16[8,4], index: 2, kind: input, shape index: {}]   ;;  %s1147_s3 = inlined_call_operand.vmem [shape: f32[8,1], index: 3, kind: input, shape index: {}]   ;;  %s1148_s4 = inlined_call_operand.vmem [shape: bf16[8,24], index: 4, kind: input, shape index: {}]   ;;  %s1149_s5 = inlined_call_operand.vmem [shape: f32[8,1], index: 5, kind: input, shape index: {}]   ;;  %s1150_s6 = inlined_call_operand.vmem [shape: bf16[8,24], index: 6, kind: input, shape index: {}]   ;;  %s1151_s7 = inlined_call_operand.vmem [shape: f32[8,1], index: 7, kind: input, shape index: {}]   ;;  %s1152_s8 = inlined_call_operand.vmem [shape: bf16[32,8], index: 8, kind: input, shape index: {}]   ;;  %s1153_s9 = inlined_call_operand.vmem [shape: f32[32,1], index: 9, kind: input, shape index: {}]   ;;  %s1154_s10 = inlined_call_operand.hbm [shape: f32[2,32,256], index: 10, kind: output, shape index: {}]  }
   0x1   :  { %17 = vsyncpa [#allocation3 + $0x1], 0  ;;  %s989_s13 = smov 0   ;;  %s991_s14 = smov 0  }
   0x2   :  { %s993_s15 = smov 0   ;;  %s995_s16 = smov 0  }
   0x3 LB: > { %s1010_s17 = sadd.s32 4294967295, %s925_s16   ;;  %s746_s18 = sadd.s32 4294967294, %s925_s16   ;;  %s925_s16 = sphi %s995_s16, %s1162_s16   ;;  %s921_s15 = sphi %s993_s15, %s1161_s15   ;;  %s917_s14 = sphi %s991_s14, %s1160_s14   ;;  %s913_s13 = sphi %s989_s13, %s1159_s13  }
   0x4   : > { %s1014_s19 = sadd.s32 1, %s925_s16   ;;  %s245_s20 = sadd.s32 1, %s921_s15 }
   0x5   : > { %s242_s21 = ssub.s32 %s925_s16, %s1014_s19  ;;  %p255_p0 = scmp.ne.s32.totalorder %s921_s15, %s917_s14 }
   0x6   : > { %p243_p1 = scmp.eq.s32.totalorder %s242_s21, 0  ;;  %p256_p2 = scmp.eq.s32.totalorder %s1010_s17, 1 }
   0x7   : > { %p261_p3 = scmp.ne.s32.totalorder %s917_s14, %s913_s13  ;;  %p262_p4 = scmp.eq.s32.totalorder %s746_s18, 1 }
   0x8   : > { %s1025_s22 = scalar_select %p243_p1, %s921_s15, %s245_s20  }
   0x9   : > { %p1027_p5 = por %p256_p2, %p255_p0  ;;  %p1031_p6 = por %p262_p4, %p261_p3 }
   0xa   : > { %p749_p7 = scmp.ge.s32.totalorder %s925_s16, 1  ;;  %p315_p8 = scmp.lt.s32.totalorder %s925_s16, 3 }
   0xc   : > { %p316_p9 = pnand %p749_p7, %p315_p8 }
   0xd   : > { %p353_p10 = scmp.lt.s32.totalorder (!%p316_p9), %s1010_s17, 1  ;;  %s1155_s20 = smov (!%p316_p9), 16  }
   0xe   : > { %319 = sbr.rel (%p316_p9) target bundleno = 835 (0x343), region = 60  ;;  %s929_s21 = smov (!%p316_p9), 112  }
   0xf   : > { %s350_s29 = sand.u32 (!%p316_p9), 1, %s917_s14   ;;  %s791_s12 = sshll.u32 (!%p316_p9), %s1010_s17, 6 }
  0x10   : > { %s750_s30 = sshll.u32 (!%p316_p9), %s350_s29, 6  ;;  %s680_s25 = scalar_lea.hbm (!%p316_p9), %s1154_s10, %s791_s12 }
  0x13   : > { %v927_v0 = vmov 0   ;;  %v361_v1 = vld [vmem:[%s1147_s3] sm:$0xff]  ;;  %s354_s27 = scalar_select %p353_p10, %s1010_s17, 1  ;;  %vm375_vm0 = vcmask 1041408   ;;  %vm371_vm1 = vcmask 31744   ;;  %v577_v19 = vld [vmem:[%s1153_s9 + $0x10] sm:$0xff]  ;;  %v408_v22 = vlaneseq }
  0x14   : > { %840 = vset.pattern.permute.xlu0 %v927_v0  ;;  %851 = vset.pattern.permute.xlu1 %v927_v0  ;;  %v360_v7 = vld [vmem:[%s1146_s2] sm:$0xf]  ;;  %v578_v23 = vld [vmem:[%s1153_s9 + $0x18] sm:$0xff]  ;;  %vm456_vm4 = vcmask 1043456   ;;  %vm930_vm7 = vmmov 1   ;;  %vm452_vm9 = vcmask 195584  }
  0x15   : > { %364 = vperm.xlu0 %840, %v361_v1   ;;  %862 = vset.pattern.permute.xlu2 %v927_v0  ;;  %s788_s28 = sshll.u32 %s354_s27, 2  ;;  %v526_v18 = vld [vmem:[%s1151_s7] sm:$0xff]  ;;  %v1067_v24 = vand.u32 127, %v408_v22  ;;  %s931_s27 = smov 127  }
  0x16   : > { %s357_s11 = scalar_lea.vmem %s1144_s0, %s788_s28  ;;  %v446_v20 = vld [vmem:[%s1149_s5] sm:$0xff]  ;;  %s932_s28 = smov 1  }
  0x17   : > { %v359_v2 = vld [vmem:[%s357_s11] sm:$0xf]  ;;  %v410_v25 = vadd.s32 128, %v1067_v24  ;;  %vm432_vm2 = vcmp.lt.s32.totalorder %v1067_v24, 112  ;;  %vm412_vm5 = vcmp.lt.s32.totalorder %v1067_v24, 16  ;;  %vm511_vm12 = vcmp.lt.s32.totalorder %v1067_v24, 127 }
  0x18   : > { %368 = vst [vmem:[#allocation1] ss:$4 sm:$0xff] %v359_v2  ;;  %v575_v21 = vld [vmem:[%s1153_s9] sm:$0xff]  ;;  %vm755_vm6 = vmneg %vm412_vm5  ;;  %s352_s11 = scalar_lea.vmem [#allocation2], %s750_s30  ;;  %s669_s17 = scalar_lea.sflag [#allocation3], %s350_s29 }
  0x19   : > { %vm427_vm3 = vcmp.ge.s32.totalorder %v410_v25, 240  ;;  %vm756_vm8 = vmpackc.low %vm930_vm7, %vm755_vm6  ;;  %v445_v43 = vld [vmem:[%s1148_s4] sm:$0xf]  ;;  %s681_s26 = sshll.u32 %s352_s11, 4  ;;  %s682_s26 = int_to_ptr.vmem [resolvable:$true] %s681_s26 }
  0x1a   : > { %v411_v54 = vld [vmem:[%s1145_s1] sm:$0x3] }
  0x1b   : > { %vm506_vm10 = vcmp.eq.s32.totalorder %v411_v54, 15  ;;  %vm491_vm11 = vcmp.eq.s32.totalorder %v411_v54, 0 }
  0x1c   : > { %v514_v55 = vsel %vm506_vm10, 1, %v927_v0  ;;  %v499_v59 = vsel %vm491_vm11, 1, %v927_v0 }
  0x1d   : > { %v515_v56 = vperm.slane %v514_v55, 0  ;;  %v516_v57 = vperm.slane %v514_v55, 1  ;;  %v500_v1 = vperm.slane %v499_v59, 0 }
  0x1f   : > { %v369_v3 = vld.sshfl [vmem:[#allocation1] sm:$0xff pattern:$0x73625140]  ;;  %v370_v4 = vld.sshfl [vmem:[#allocation1 + $0x8] sm:$0xff pattern:$0x73625140] }
  0x20   : > { %v376_v5 = vsel %vm375_vm0, %v369_v3, 0  ;;  %v378_v6 = vsel %vm375_vm0, %v370_v4, 0  ;;  %vm517_vm13 = vcmp.eq.s32.totalorder %v515_v56, 1  ;;  %vm518_vm14 = vcmp.eq.s32.totalorder %v516_v57, 1 }
  0x21   : > { %387 = vmatpush.bf16.msra.mxu0 %v376_v5  ;;  %400 = vmatpush.bf16.msra.mxu1 %v378_v6  ;;  %v501_v4 = vperm.slane %v499_v59, 1  ;;  %vm792_vm15 = vcmp.ne.s32.totalorder %v500_v1, 1  ;;  %vm496_vm0 = vcmp.lt.s32.totalorder %v1067_v24, 1 }
  0x24   : > { %753 = vmatmul.msk.bf16.vlgmr.msra.gmra.mxu0 %vm371_vm1, %v360_v7  ;;  %754 = vmatmul.msk.bf16.vlgmr.msra.gmra.mxu1 %vm371_vm1, %v360_v7  ;;  %vm793_vm1 = vcmp.ne.s32.totalorder %v501_v4, 1 }
  0x87   : > { %v365_v8 = vpop.permute.xlu0 %364 }
  0xa1   : > { %v389_v9 = vpop.f32.mrf.mxu0  ;;  %v402_v10 = vpop.f32.mrf.mxu1 }
  0xa2   : > { %v390_v11 = vadd.f32 %v389_v9, %v365_v8  ;;  %v403_v12 = vadd.f32 %v402_v10, %v365_v8 }
  0xa4   : > { %v406_v13 = vmax.f32 %v390_v11, 0.0  ;;  %v407_v14 = vmax.f32 %v403_v12, 0.0 }
  0xa6   : > { %v846_v15 = vpack.i.bf16 %v407_v14, %v406_v13 }
  0xa8   : > { %847 = vrot.lane.b32.xlu1 %v846_v15, %s1155_s20  ;;  %842 = vrot.lane.b32.xlu0 %v846_v15, %s929_s21  ;;  %v525_v15 = vld [vmem:[%s1150_s6] sm:$0xf]  ;;  %s883_s21 = scalar_lea.hbm %s1154_s10, 128 }
  0xa9   : > { %v391_v16 = vpop.f32.mrf.mxu0  ;;  %v404_v17 = vpop.f32.mrf.mxu1 }
  0xaa   : > { %v576_v16 = vld [vmem:[%s1153_s9 + $0x8] sm:$0xff] }
  0xb0   : > { %529 = vperm.xlu0 %840, %v526_v18   ;;  %449 = vperm.xlu1 %851, %v446_v20  }
  0xb8   : > { %591 = vperm.xlu0 %840, %v577_v19   ;;  %581 = vperm.xlu1 %851, %v575_v21  }
  0xc0   : > { %596 = vperm.xlu1 %851, %v578_v23  }
 0x11a   : > { %v848_v26 = vpop.permute.xlu1 %847  ;;  %v843_v27 = vpop.permute.xlu0 %842 }
 0x11b   : > { %v845_v28 = vunpack.i.h.bf16 %v843_v27  ;;  %v844_v29 = vunpack.i.l.bf16 %v843_v27  ;;  %v850_v30 = vunpack.i.h.bf16 %v848_v26  ;;  %v849_v31 = vunpack.i.l.bf16 %v848_v26 }
 0x11d   : > { %v433_v32 = vsel %vm432_vm2, %v844_v29, %v845_v28  ;;  %v434_v33 = vsel %vm432_vm2, %v845_v28, %v844_v29  ;;  %v419_v38 = vsel %vm412_vm5, %v850_v30, %v849_v31  ;;  %v418_v40 = vsel %vm412_vm5, %v849_v31, %v850_v30  ;;  %vm762_vm2 = vmpackc.low %vm930_vm7, %vm792_vm15  ;;  %v789_v28 = vld [vmem:[%s1152_s8] sm:$0xff]  ;;  %v790_v31 = vld [vmem:[%s1152_s8 + $0x8] sm:$0xff] }
 0x11e   : > { %v443_v34 = vpack.c.bf16 %v433_v32, %v433_v32  ;;  %v440_v35 = vsel %vm427_vm3, 0.0, %v434_v33  ;;  %v757_v41 = vpack.c.bf16 %v406_v13, %v419_v38  ;;  %v442_v42 = vpack.c.bf16 %v407_v14, %v418_v40  ;;  %vm767_vm3 = vmpackc.low %vm930_vm7, %vm793_vm1 }
 0x11f   : > { %v444_v36 = vpack.c.bf16 %v440_v35, %v440_v35  ;;  %vm609_vm5 = vcmask 64512  }
 0x120   : > { %v458_v37 = vsel %vm456_vm4, %v443_v34, 0 }
 0x121   : > { %469 = vmatpush.bf16.msrb.mxu0 %v458_v37  ;;  %v461_v39 = vsel %vm456_vm4, %v444_v36, 0 }
 0x122   : > { %482 = vmatpush.bf16.msrb.mxu1 %v461_v39  ;;  %v450_v44 = vpop.permute.xlu1 %449  ;;  %v530_v17 = vpop.permute.xlu0 %529 }
 0x125   : > { %758 = vmatpush.bf16.msk.msrb.mxu0 %vm756_vm8, %v757_v41 }
 0x126   : > { %483 = vmatpush.bf16.msrb.mxu1 %v442_v42 }
 0x128   : > { %759 = vmatmul.msk.bf16.vlgmr.msrb.gmra.mxu0 %vm452_vm9, %v445_v43 }
 0x129   : > { %760 = vmatmul.msk.bf16.vlgmr.msrb.gmra.mxu1 %vm452_vm9, %v445_v43 }
 0x12a   : > { %v582_v32 = vpop.permute.xlu1 %581  ;;  %v592_v42 = vpop.permute.xlu0 %591 }
 0x1a5   : > { %v472_v45 = vpop.f32.mrf.mxu0 }
 0x1a6   : > { %v473_v46 = vadd.f32 %v472_v45, %v450_v44  ;;  %v485_v47 = vpop.f32.mrf.mxu1 }
 0x1a7   : > { %v486_v48 = vadd.f32 %v485_v47, %v450_v44  ;;  %v597_v47 = vpop.permute.xlu1 %596 }
 0x1a8   : > { %v489_v49 = vmax.f32 %v473_v46, 0.0 }
 0x1a9   : > { %v490_v50 = vmax.f32 %v486_v48, 0.0 }
 0x1ab   : > { %v852_v51 = vpack.i.bf16 %v490_v50, %v489_v49 }
 0x1ad   : > { %v474_v52 = vpop.f32.mrf.mxu0  ;;  %853 = vrot.lane.b32.xlu2 %v852_v51, %s931_s27  ;;  %s683_s27 = sshll.u32 %s680_s25, 4  ;;  %s684_s27 = int_to_ptr.hbm [resolvable:$true] %s683_s27 }
 0x1ae   : > { %v487_v53 = vpop.f32.mrf.mxu1 }
 0x1b5   : > { %858 = vrot.lane.b32.xlu2 %v852_v51, %s932_s28  ;;  %s877_s28 = sshra.s32 %s684_s27, 4  ;;  %s878_s28 = int_to_ptr.hbm [resolvable:$true] %s877_s28 }
 0x1b6   : > { %s879_s30 = scalar_lea.hbm %s878_s28, 64  ;;  %p884_p0 = scmp.lt.s32.totalorder %s878_s28, %s1154_s10 }
 0x1b7   : > { %p880_p11 = scmp.ne.s32.totalorder %s878_s28, %s879_s30  ;;  %p885_p1 = scmp.lt.s32.totalorder %s883_s21, %s879_s30 }
 0x1b9   : > { %p881_p12 = pnand %p880_p11, %p1027_p5  ;;  %p886_p2 = por %p885_p1, %p884_p0 }
 0x1bb   : > { %p882_p13 = pneg %p881_p12 }
 0x1bd   : > { %586 = vperm.xlu2 %862, %v576_v16   ;;  %p887_p3 = pnand %p886_p2, %p882_p13 }
 0x207   : > { %v854_v58 = vpop.permute.xlu2 %853 }
 0x208   : > { %v856_v60 = vunpack.i.h.bf16 %v854_v58  ;;  %v855_v61 = vunpack.i.l.bf16 %v854_v58 }
 0x20a   : > { %v512_v62 = vsel %vm511_vm12, %v855_v61, %v856_v60  ;;  %v513_v63 = vsel %vm511_vm12, %v856_v60, %v855_v61 }
 0x20b   : > { %v519_v2 = vsel %vm517_vm13, 0.0, %v512_v62  ;;  %v520_v3 = vsel %vm518_vm14, 0.0, %v513_v63 }
 0x20c   : > { %v523_v5 = vpack.c.bf16 %v519_v2, %v519_v2  ;;  %v524_v6 = vpack.c.bf16 %v520_v3, %v520_v3 }
 0x20e   : > { %v536_v7 = vsel %vm456_vm4, %v523_v5, 0  ;;  %v539_v8 = vsel %vm456_vm4, %v524_v6, 0 }
 0x20f   : > { %v859_v0 = vpop.permute.xlu2 %858  ;;  %547 = vmatpush.bf16.msra.mxu0 %v536_v7  ;;  %560 = vmatpush.bf16.msra.mxu1 %v539_v8 }
 0x210   : > { %v861_v9 = vunpack.i.h.bf16 %v859_v0  ;;  %v860_v10 = vunpack.i.l.bf16 %v859_v0 }
 0x212   : > { %v497_v11 = vsel %vm496_vm0, %v860_v10, %v861_v9  ;;  %v498_v12 = vsel %vm496_vm0, %v861_v9, %v860_v10 }
 0x213   : > { %v763_v13 = vpack.c.bf16 %v489_v49, %v498_v12  ;;  %v768_v14 = vpack.c.bf16 %v490_v50, %v497_v11 }
 0x215   : > { %764 = vmatpush.bf16.msk.msra.mxu0 %vm762_vm2, %v763_v13  ;;  %769 = vmatpush.bf16.msk.msra.mxu1 %vm767_vm3, %v768_v14 }
 0x217   : > { %v587_v37 = vpop.permute.xlu2 %586 }
 0x218   : > { %765 = vmatmul.msk.bf16.vlgmr.msra.gmra.mxu0 %vm452_vm9, %v525_v15  ;;  %770 = vmatmul.msk.bf16.vlgmr.msra.gmra.mxu1 %vm452_vm9, %v525_v15 }
 0x295   : > { %v550_v18 = vpop.f32.mrf.mxu0  ;;  %v563_v19 = vpop.f32.mrf.mxu1 }
 0x296   : > { %v551_v20 = vadd.f32 %v550_v18, %v530_v17  ;;  %v564_v21 = vadd.f32 %v563_v19, %v530_v17 }
 0x298   : > { %v567_v22 = vmax.f32 %v551_v20, 0.0  ;;  %v568_v23 = vmax.f32 %v564_v21, 0.0 }
 0x29a   : > { %v573_v24 = vpack.c.bf16 %v567_v22, %v567_v22  ;;  %v574_v25 = vpack.c.bf16 %v568_v23, %v568_v23 }
 0x29c   : > { %v617_v26 = vsel %vm456_vm4, %v573_v24, 0  ;;  %v620_v27 = vsel %vm456_vm4, %v574_v25, 0 }
 0x29d   : > { %629 = vmatpush.bf16.msra.mxu2 %v617_v26  ;;  %648 = vmatpush.bf16.msra.mxu3 %v620_v27  ;;  %v552_v29 = vpop.f32.mrf.mxu0  ;;  %v565_v30 = vpop.f32.mrf.mxu1 }
 0x2a0   : > { %779 = vmatmul.msk.bf16.vlgmr.msra.gmra.mxu2 %vm609_vm5, %v789_v28  ;;  %781 = vmatmul.msk.bf16.vlgmr.msra.gmra.mxu3 %vm609_vm5, %v789_v28 }
 0x2b0   : > { %780 = vmatmul.msk.bf16.gmra.mxu2 %vm609_vm5, %v790_v31  ;;  %782 = vmatmul.msk.bf16.gmra.mxu3 %vm609_vm5, %v790_v31 }
 0x323   : > { %v631_v33 = vpop.f32.mrf.mxu2  ;;  %v650_v34 = vpop.f32.mrf.mxu3 }
 0x324   : > { %v632_v35 = vadd.f32 %v631_v33, %v582_v32  ;;  %v651_v36 = vadd.f32 %v650_v34, %v582_v32 }
 0x326   : > { %660 = vst [vmem:[%s352_s11] sm:$0xff] %v632_v35 }
 0x327   : > { %661 = vst [vmem:[%s352_s11 + $0x8] sm:$0xff] %v651_v36 }
 0x32b   : > { %v633_v38 = vpop.f32.mrf.mxu2  ;;  %v652_v39 = vpop.f32.mrf.mxu3 }
 0x32c   : > { %v634_v40 = vadd.f32 %v633_v38, %v587_v37  ;;  %v653_v41 = vadd.f32 %v652_v39, %v587_v37 }
 0x32e   : > { %662 = vst [vmem:[%s352_s11 + $0x10] sm:$0xff] %v634_v40 }
 0x32f   : > { %663 = vst [vmem:[%s352_s11 + $0x18] sm:$0xff] %v653_v41 }
 0x333   : > { %v636_v43 = vpop.f32.mrf.mxu2  ;;  %v655_v44 = vpop.f32.mrf.mxu3 }
 0x334   : > { %v637_v45 = vadd.f32 %v636_v43, %v592_v42  ;;  %v656_v46 = vadd.f32 %v655_v44, %v592_v42 }
 0x336   : > { %664 = vst [vmem:[%s352_s11 + $0x20] sm:$0xff] %v637_v45 }
 0x337   : > { %665 = vst [vmem:[%s352_s11 + $0x28] sm:$0xff] %v656_v46 }
 0x33b   : > { %v638_v48 = vpop.f32.mrf.mxu2  ;;  %v657_v49 = vpop.f32.mrf.mxu3 }
 0x33c   : > { %v639_v50 = vadd.f32 %v638_v48, %v597_v47  ;;  %v658_v51 = vadd.f32 %v657_v49, %v597_v47 }
 0x33e   : > { %666 = vst [vmem:[%s352_s11 + $0x30] sm:$0xff] %v639_v50 }
 0x33f   : > { %667 = vst [vmem:[%s352_s11 + $0x38] sm:$0xff] %v658_v51 }
 0x340   : > { %890 = shalt.err (!%p887_p3)
}
 0x341   : > { %s933_s29 = smov 256   ;;  %s1158_s11 = smov 16  }
 0x342   : > { %794 = dma.vmem_to_hbm [thread:$0]  (%p1027_p5), %s682_s26, 1024, %s684_s27, %s669_s17, %s933_s29, %s933_s29, %s1158_s11  }
 0x343 PF: > { %p800_p4 = scmp.ge.s32.totalorder %s925_s16, 2  ;;  %s698_s12 = sand.u32 1, %s913_s13  }
 0x344   : > { %s699_s20 = scalar_lea.sflag [#allocation3], %s698_s12 }
 0x345   : > { %p797_p7 = pnand %p800_p4, %p1031_p6 }
 0x347   : > { %p798_p8 = pneg %p797_p7 }
 0x349   : > { %908 = dma.done.wait (%p798_p8), %s699_s20, 1024  }
 0x34a   : > { %910 = vsyncadd (%p798_p8), %s699_s20, 4294966272  ;;  %p20_p9 = scmp.ge.s32.totalorder %s1014_s19, 4   ;;  %s1159_s13 = smov %s917_s14 }
 0x34b   : > { %s1160_s14 = smov %s921_s15  ;;  %s1161_s15 = smov %s1025_s22 }
 0x34c   : > { %s1162_s16 = smov %s1014_s19  ;;  %22 = sbr.rel (!%p20_p9) target bundleno = 3 (0x3), region = 95 }
 0x351   :  { %705 = vsyncpa [#allocation3], 1 }
 0x352   :  { %707 = vsyncpa [#allocation3 + $0x1], 1 }

</bundles_post_ra>
